<compile_context>
chip_gen: v7x
topology: tpu7x:2x2x1
jax: 0.10.0
libtpu: 0.0.40
codegen_flags: <defaults>
</compile_context>

<pallas_src>
import functools

import jax
import jax.numpy as jnp
from jax.experimental import pallas as pl
from jax.experimental.pallas import tpu as pltpu


def _clip_head_kernel(t_ref, img_ref, w1_ref, b1_ref, w2_ref, b2_ref,
                      w3_ref, b3_ref, out_ref, acc_ref):
    # t_ref:   [1, Bp, TP]   text-embed columns owned by this K-tile
    # img_ref: [Bp, D]       image embeds (resident across the whole grid)
    # w1_ref:  [1, TP*D, H]  bf16 layer-1 weight K-tile (streamed per grid step)
    # b1..b3, w2, w3:        small resident params
    # out_ref: [Bp, Cp]      logits (written once, at the last grid step)
    # acc_ref: [Bp, H] f32   layer-1 accumulator scratch (persists over grid)
    k = pl.program_id(0)
    nk = pl.num_programs(0)
    tp = t_ref.shape[2]
    d = img_ref.shape[1]

    @pl.when(k == 0)
    def _init():
        # Fold the layer-1 bias into the accumulator init.
        acc_ref[...] = jnp.broadcast_to(b1_ref[...], acc_ref.shape)

    img = img_ref[...]        # [Bp, D] f32
    t_blk = t_ref[0]          # [Bp, TP] f32

    # Build this K-tile of the flattened outer product on the fly, one text
    # column at a time:  x[:, (k*TP+p)*D : ...+D] == text[:, k*TP+p] * image.
    # Static Python unroll (TP is small); operands cast to bf16 for the MXU,
    # accumulation stays f32.
    acc = acc_ref[...]
    for p in range(tp):
        x_p = (t_blk[:, p:p + 1] * img).astype(jnp.bfloat16)        # [Bp, D]
        w_p = w1_ref[0, p * d:(p + 1) * d, :]                        # [D, H] bf16
        acc = acc + jnp.dot(x_p, w_p, preferred_element_type=jnp.float32)
    acc_ref[...] = acc

    @pl.when(k == nk - 1)
    def _finish():
        # ReLU; Dropout(p=0) is identity.
        h1 = jnp.maximum(acc_ref[...], 0.0)
        h2 = jnp.dot(h1, w2_ref[...], preferred_element_type=jnp.float32) + b2_ref[...]
        h2 = jnp.maximum(h2, 0.0)
        logits = jnp.dot(h2, w3_ref[...], preferred_element_type=jnp.float32) + b3_ref[...]
        out_ref[...] = logits.astype(out_ref.dtype)


@functools.partial(jax.jit, static_argnames=("tp",))
def clip_head_forward(text_embeds, image_embeds, params, *, tp=None):
    w1, b1, w2, b2, w3, b3 = params
    B, D = text_embeds.shape
    K, H = w1.shape
    assert K == D * D, "W1 must have D*D input features"
    C = w3.shape[1]
    f32 = jnp.float32

    # Pad batch to a multiple of 8 sublanes, classes to a multiple of 128 lanes.
    Bp = max(8, ((B + 7) // 8) * 8)
    Cp = ((C + 127) // 128) * 128

    # K-tile size: TP text columns per grid step -> W1 tile of TP*D rows.
    # Auto-sized to ~8 MiB of bf16 per tile (double-buffered comfortably inside
    # a 48 MiB scoped-VMEM budget on every generation incl. v7x's 64 MiB VMEM).
    if tp is None:
        tp = max(1, min(D, (8 * 1024 * 1024) // max(1, D * H * 2)))
    while D % tp:
        tp -= 1
    np_tiles = D // tp

    text_p = jnp.zeros((Bp, D), f32).at[:B].set(text_embeds.astype(f32))
    img_p = jnp.zeros((Bp, D), f32).at[:B].set(image_embeds.astype(f32))
    # Re-tile the (tiny) text embeds so each grid step receives exactly its TP
    # columns as a full block: [NP, Bp, TP].
    text_r = text_p.reshape(Bp, np_tiles, tp).transpose(1, 0, 2)

    # Layer-1 weights: bf16 stream (dominant HBM traffic), viewed as one
    # contiguous K-tile per grid step: [NP, TP*D, H].  (Free reshape; astype is
    # a no-op when W1 is already stored in bf16.)
    w1_r = w1.astype(jnp.bfloat16).reshape(np_tiles, tp * D, H)

    w3_p = jnp.zeros((H, Cp), f32).at[:, :C].set(w3.astype(f32))
    b3_p = jnp.zeros((1, Cp), f32).at[:, :C].set(b3.astype(f32))

    out = pl.pallas_call(
        _clip_head_kernel,
        out_shape=jax.ShapeDtypeStruct((Bp, Cp), f32),
        grid_spec=pltpu.PrefetchScalarGridSpec(
            num_scalar_prefetch=0,
            grid=(np_tiles,),
            in_specs=[
                # text K-tile (tiny, re-fetched per step)
                pl.BlockSpec((1, Bp, tp), lambda k: (k, 0, 0)),
                # image embeds: same block every step -> fetched once, resident
                pl.BlockSpec((Bp, D), lambda k: (0, 0)),
                # W1 K-tile: the streamed hot operand. Default BlockSpec
                # pipelining double-buffers it; raise via
                # pipeline_mode=pl.Buffered(3) if the DMA is still exposed.
                pl.BlockSpec((1, tp * D, H), lambda k: (k, 0, 0)),
                pl.BlockSpec((1, H), lambda k: (0, 0)),    # b1 (resident)
                pl.BlockSpec((H, H), lambda k: (0, 0)),    # W2 (resident)
                pl.BlockSpec((1, H), lambda k: (0, 0)),    # b2 (resident)
                pl.BlockSpec((H, Cp), lambda k: (0, 0)),   # W3 (resident, C padded)
                pl.BlockSpec((1, Cp), lambda k: (0, 0)),   # b3 (resident, C padded)
            ],
            out_specs=pl.BlockSpec((Bp, Cp), lambda k: (0, 0)),
            scratch_shapes=[pltpu.VMEM((Bp, H), jnp.float32)],   # layer-1 accumulator
        ),
        compiler_params=pltpu.CompilerParams(
            dimension_semantics=("arbitrary",),        # K is a reduction axis
            vmem_limit_bytes=48 * 1024 * 1024,
        ),
    )(text_r, img_p, w1_r,
      b1.astype(f32), w2.astype(f32), b2.astype(f32), w3_p, b3_p)

    return out[:B, :C]


def init_params(key, d_in, hidden, n_classes):
    """Deterministic PyTorch-style (uniform +/- 1/sqrt(fan_in)) init.

    W1 (the streamed weight) is stored in bf16; everything else stays f32.
    """
    ks = jax.random.split(key, 6)

    def lin(kw, kb, fan_in, fan_out, w_dtype=jnp.float32):
        bound = 1.0 / jnp.sqrt(jnp.float32(fan_in))
        w = jax.random.uniform(kw, (fan_in, fan_out), jnp.float32, -bound, bound)
        b = jax.random.uniform(kb, (1, fan_out), jnp.float32, -bound, bound)
        return w.astype(w_dtype), b

    w1, b1 = lin(ks[0], ks[1], d_in, hidden, w_dtype=jnp.bfloat16)
    w2, b2 = lin(ks[2], ks[3], hidden, hidden)
    w3, b3 = lin(ks[4], ks[5], hidden, n_classes)
    return (w1, b1, w2, b2, w3, b3)


if __name__ == "__main__":
    # Small stand-ins for the module's sizes: D, H play the role of 512.
    B, D, H, C = 2, 32, 32, 2
    key = jax.random.PRNGKey(0)
    k_t, k_i, k_p = jax.random.split(key, 3)
    text_embeds = jax.random.normal(k_t, (B, D), jnp.float32)
    image_embeds = jax.random.normal(k_i, (B, D), jnp.float32)
    params = init_params(k_p, D * D, H, C)

    # tp=8 -> 4 grid steps at the demo size, exercising the K-tiled accumulator.
    logits = clip_head_forward(text_embeds, image_embeds, params, tp=8)
    logits = jax.block_until_ready(logits)

    # Pure-JAX reference of the PyTorch forward semantics (layer 1 uses the same
    # bf16 operands / f32 accumulation as the kernel).
    w1, b1, w2, b2, w3, b3 = params
    flat = (text_embeds[:, :, None] * image_embeds[:, None, :]).reshape(B, D * D)
    h1 = jnp.dot(flat.astype(jnp.bfloat16), w1,
                 preferred_element_type=jnp.float32) + b1
    h1 = jnp.maximum(h1, 0.0)
    h2 = jnp.maximum(h1 @ w2 + b2, 0.0)
    ref = h2 @ w3 + b3

    assert logits.shape == (B, C)
    assert jnp.allclose(logits, ref, atol=1e-2, rtol=1e-2), (logits, ref)
    print("KERNEL_OK")
</pallas_src>

<mosaic_0001>
module attributes {stable_mosaic.version = 11 : i64} {
  func.func @_clip_head_kernel(%arg0: i32, %arg1: memref<1x8x8xf32, #tpu.memory_space<vmem>>, %arg2: memref<8x32xf32, #tpu.memory_space<vmem>>, %arg3: memref<1x256x32xbf16, #tpu.memory_space<vmem>>, %arg4: memref<1x32xf32, #tpu.memory_space<vmem>>, %arg5: memref<32x32xf32, #tpu.memory_space<vmem>>, %arg6: memref<1x32xf32, #tpu.memory_space<vmem>>, %arg7: memref<32x128xf32, #tpu.memory_space<vmem>>, %arg8: memref<1x128xf32, #tpu.memory_space<vmem>>, %arg9: memref<8x128xf32, #tpu.memory_space<vmem>>, %arg10: memref<8x32xf32, #tpu.memory_space<vmem>>) attributes {dimension_semantics = [#tpu.dimension_semantics<arbitrary>], iteration_bounds = array<i64: 4>, scalar_prefetch = 0 : i64, scratch_operands = 1 : i64, tpu.core_type = #tpu.core_type<tc>, window_params = [{transform_indices = @transform_0, window_bounds = array<i64: 1, 8, 8>}, {pipeline_mode = #tpu.pipeline_mode<synchronous>, transform_indices = @transform_1, window_bounds = array<i64: 8, 32>}, {transform_indices = @transform_2, window_bounds = array<i64: 1, 256, 32>}, {pipeline_mode = #tpu.pipeline_mode<synchronous>, transform_indices = @transform_3, window_bounds = array<i64: 1, 32>}, {pipeline_mode = #tpu.pipeline_mode<synchronous>, transform_indices = @transform_4, window_bounds = array<i64: 32, 32>}, {pipeline_mode = #tpu.pipeline_mode<synchronous>, transform_indices = @transform_5, window_bounds = array<i64: 1, 32>}, {pipeline_mode = #tpu.pipeline_mode<synchronous>, transform_indices = @transform_6, window_bounds = array<i64: 32, 128>}, {pipeline_mode = #tpu.pipeline_mode<synchronous>, transform_indices = @transform_7, window_bounds = array<i64: 1, 128>}, {pipeline_mode = #tpu.pipeline_mode<synchronous>, transform_indices = @transform_8, window_bounds = array<i64: 8, 128>}]} {
    %c0_i32 = arith.constant 0 : i32
    %0 = arith.cmpi eq, %arg0, %c0_i32 : i32
    %1 = arith.extui %0 : i1 to i32
    %c0_i32_0 = arith.constant 0 : i32
    %2 = arith.cmpi ne, %1, %c0_i32_0 : i32
    scf.if %2 {
      %c0_34 = arith.constant 0 : index
      %c0_35 = arith.constant 0 : index
      %75 = vector.load %arg4[%c0_34, %c0_35] : memref<1x32xf32, #tpu.memory_space<vmem>>, vector<1x32xf32>
      %76 = vector.shape_cast %75 : vector<1x32xf32> to vector<1x32xf32>
      %77 = vector.broadcast %76 : vector<1x32xf32> to vector<8x32xf32>
      %c0_36 = arith.constant 0 : index
      %c0_37 = arith.constant 0 : index
      %78 = vector.load %arg10[%c0_36, %c0_37] : memref<8x32xf32, #tpu.memory_space<vmem>>, vector<8x32xf32>
      tpu.vector_store %arg10[%c0_36, %c0_37], %77 {strides = array<i32>} : memref<8x32xf32, #tpu.memory_space<vmem>>, vector<8x32xf32>,
    } else {
    }
    %c0 = arith.constant 0 : index
    %c0_1 = arith.constant 0 : index
    %3 = vector.load %arg2[%c0, %c0_1] : memref<8x32xf32, #tpu.memory_space<vmem>>, vector<8x32xf32>
    %c0_2 = arith.constant 0 : index
    %c0_3 = arith.constant 0 : index
    %c0_4 = arith.constant 0 : index
    %4 = vector.load %arg1[%c0_2, %c0_3, %c0_4] : memref<1x8x8xf32, #tpu.memory_space<vmem>>, vector<1x8x8xf32>
    %5 = vector.shape_cast %4 : vector<1x8x8xf32> to vector<8x8xf32>
    %c0_5 = arith.constant 0 : index
    %c0_6 = arith.constant 0 : index
    %6 = vector.load %arg10[%c0_5, %c0_6] : memref<8x32xf32, #tpu.memory_space<vmem>>, vector<8x32xf32>
    %7 = vector.extract_strided_slice %5 {offsets = [0, 0], sizes = [8, 1], strides = [1, 1]} : vector<8x8xf32> to vector<8x1xf32>
    %8 = vector.broadcast %7 : vector<8x1xf32> to vector<8x32xf32>
    %9 = arith.mulf %8, %3 : vector<8x32xf32>
    %10 = arith.truncf %9 : vector<8x32xf32> to vector<8x32xbf16>
    %c0_7 = arith.constant 0 : index
    %c0_8 = arith.constant 0 : index
    %c0_9 = arith.constant 0 : index
    %11 = vector.load %arg3[%c0_7, %c0_8, %c0_9] : memref<1x256x32xbf16, #tpu.memory_space<vmem>>, vector<1x32x32xbf16>
    %12 = vector.shape_cast %11 : vector<1x32x32xbf16> to vector<32x32xbf16>
    %cst = arith.constant dense<0.000000e+00> : vector<8x32xf32>
    %13 = tpu.matmul %10, %12, %cst {dimension_numbers = #tpu.dot_dimension_numbers<[1], [0], [0], [1], [0, 0, 1, 1], [], []>} : vector<8x32xbf16>, vector<32x32xbf16>, vector<8x32xf32> -> vector<8x32xf32>
    %14 = arith.addf %6, %13 : vector<8x32xf32>
    %15 = vector.extract_strided_slice %5 {offsets = [0, 1], sizes = [8, 1], strides = [1, 1]} : vector<8x8xf32> to vector<8x1xf32>
    %16 = vector.broadcast %15 : vector<8x1xf32> to vector<8x32xf32>
    %17 = arith.mulf %16, %3 : vector<8x32xf32>
    %18 = arith.truncf %17 : vector<8x32xf32> to vector<8x32xbf16>
    %c0_10 = arith.constant 0 : index
    %c32 = arith.constant 32 : index
    %c0_11 = arith.constant 0 : index
    %19 = vector.load %arg3[%c0_10, %c32, %c0_11] : memref<1x256x32xbf16, #tpu.memory_space<vmem>>, vector<1x32x32xbf16>
    %20 = vector.shape_cast %19 : vector<1x32x32xbf16> to vector<32x32xbf16>
    %cst_12 = arith.constant dense<0.000000e+00> : vector<8x32xf32>
    %21 = tpu.matmul %18, %20, %cst_12 {dimension_numbers = #tpu.dot_dimension_numbers<[1], [0], [0], [1], [0, 0, 1, 1], [], []>} : vector<8x32xbf16>, vector<32x32xbf16>, vector<8x32xf32> -> vector<8x32xf32>
    %22 = arith.addf %14, %21 : vector<8x32xf32>
    %23 = vector.extract_strided_slice %5 {offsets = [0, 2], sizes = [8, 1], strides = [1, 1]} : vector<8x8xf32> to vector<8x1xf32>
    %24 = vector.broadcast %23 : vector<8x1xf32> to vector<8x32xf32>
    %25 = arith.mulf %24, %3 : vector<8x32xf32>
    %26 = arith.truncf %25 : vector<8x32xf32> to vector<8x32xbf16>
    %c0_13 = arith.constant 0 : index
    %c64 = arith.constant 64 : index
    %c0_14 = arith.constant 0 : index
    %27 = vector.load %arg3[%c0_13, %c64, %c0_14] : memref<1x256x32xbf16, #tpu.memory_space<vmem>>, vector<1x32x32xbf16>
    %28 = vector.shape_cast %27 : vector<1x32x32xbf16> to vector<32x32xbf16>
    %cst_15 = arith.constant dense<0.000000e+00> : vector<8x32xf32>
    %29 = tpu.matmul %26, %28, %cst_15 {dimension_numbers = #tpu.dot_dimension_numbers<[1], [0], [0], [1], [0, 0, 1, 1], [], []>} : vector<8x32xbf16>, vector<32x32xbf16>, vector<8x32xf32> -> vector<8x32xf32>
    %30 = arith.addf %22, %29 : vector<8x32xf32>
    %31 = vector.extract_strided_slice %5 {offsets = [0, 3], sizes = [8, 1], strides = [1, 1]} : vector<8x8xf32> to vector<8x1xf32>
    %32 = vector.broadcast %31 : vector<8x1xf32> to vector<8x32xf32>
    %33 = arith.mulf %32, %3 : vector<8x32xf32>
    %34 = arith.truncf %33 : vector<8x32xf32> to vector<8x32xbf16>
    %c0_16 = arith.constant 0 : index
    %c96 = arith.constant 96 : index
    %c0_17 = arith.constant 0 : index
    %35 = vector.load %arg3[%c0_16, %c96, %c0_17] : memref<1x256x32xbf16, #tpu.memory_space<vmem>>, vector<1x32x32xbf16>
    %36 = vector.shape_cast %35 : vector<1x32x32xbf16> to vector<32x32xbf16>
    %cst_18 = arith.constant dense<0.000000e+00> : vector<8x32xf32>
    %37 = tpu.matmul %34, %36, %cst_18 {dimension_numbers = #tpu.dot_dimension_numbers<[1], [0], [0], [1], [0, 0, 1, 1], [], []>} : vector<8x32xbf16>, vector<32x32xbf16>, vector<8x32xf32> -> vector<8x32xf32>
    %38 = arith.addf %30, %37 : vector<8x32xf32>
    %39 = vector.extract_strided_slice %5 {offsets = [0, 4], sizes = [8, 1], strides = [1, 1]} : vector<8x8xf32> to vector<8x1xf32>
    %40 = vector.broadcast %39 : vector<8x1xf32> to vector<8x32xf32>
    %41 = arith.mulf %40, %3 : vector<8x32xf32>
    %42 = arith.truncf %41 : vector<8x32xf32> to vector<8x32xbf16>
    %c0_19 = arith.constant 0 : index
    %c128 = arith.constant 128 : index
    %c0_20 = arith.constant 0 : index
    %43 = vector.load %arg3[%c0_19, %c128, %c0_20] : memref<1x256x32xbf16, #tpu.memory_space<vmem>>, vector<1x32x32xbf16>
    %44 = vector.shape_cast %43 : vector<1x32x32xbf16> to vector<32x32xbf16>
    %cst_21 = arith.constant dense<0.000000e+00> : vector<8x32xf32>
    %45 = tpu.matmul %42, %44, %cst_21 {dimension_numbers = #tpu.dot_dimension_numbers<[1], [0], [0], [1], [0, 0, 1, 1], [], []>} : vector<8x32xbf16>, vector<32x32xbf16>, vector<8x32xf32> -> vector<8x32xf32>
    %46 = arith.addf %38, %45 : vector<8x32xf32>
    %47 = vector.extract_strided_slice %5 {offsets = [0, 5], sizes = [8, 1], strides = [1, 1]} : vector<8x8xf32> to vector<8x1xf32>
    %48 = vector.broadcast %47 : vector<8x1xf32> to vector<8x32xf32>
    %49 = arith.mulf %48, %3 : vector<8x32xf32>
    %50 = arith.truncf %49 : vector<8x32xf32> to vector<8x32xbf16>
    %c0_22 = arith.constant 0 : index
    %c160 = arith.constant 160 : index
    %c0_23 = arith.constant 0 : index
    %51 = vector.load %arg3[%c0_22, %c160, %c0_23] : memref<1x256x32xbf16, #tpu.memory_space<vmem>>, vector<1x32x32xbf16>
    %52 = vector.shape_cast %51 : vector<1x32x32xbf16> to vector<32x32xbf16>
    %cst_24 = arith.constant dense<0.000000e+00> : vector<8x32xf32>
    %53 = tpu.matmul %50, %52, %cst_24 {dimension_numbers = #tpu.dot_dimension_numbers<[1], [0], [0], [1], [0, 0, 1, 1], [], []>} : vector<8x32xbf16>, vector<32x32xbf16>, vector<8x32xf32> -> vector<8x32xf32>
    %54 = arith.addf %46, %53 : vector<8x32xf32>
    %55 = vector.extract_strided_slice %5 {offsets = [0, 6], sizes = [8, 1], strides = [1, 1]} : vector<8x8xf32> to vector<8x1xf32>
    %56 = vector.broadcast %55 : vector<8x1xf32> to vector<8x32xf32>
    %57 = arith.mulf %56, %3 : vector<8x32xf32>
    %58 = arith.truncf %57 : vector<8x32xf32> to vector<8x32xbf16>
    %c0_25 = arith.constant 0 : index
    %c192 = arith.constant 192 : index
    %c0_26 = arith.constant 0 : index
    %59 = vector.load %arg3[%c0_25, %c192, %c0_26] : memref<1x256x32xbf16, #tpu.memory_space<vmem>>, vector<1x32x32xbf16>
    %60 = vector.shape_cast %59 : vector<1x32x32xbf16> to vector<32x32xbf16>
    %cst_27 = arith.constant dense<0.000000e+00> : vector<8x32xf32>
    %61 = tpu.matmul %58, %60, %cst_27 {dimension_numbers = #tpu.dot_dimension_numbers<[1], [0], [0], [1], [0, 0, 1, 1], [], []>} : vector<8x32xbf16>, vector<32x32xbf16>, vector<8x32xf32> -> vector<8x32xf32>
    %62 = arith.addf %54, %61 : vector<8x32xf32>
    %63 = vector.extract_strided_slice %5 {offsets = [0, 7], sizes = [8, 1], strides = [1, 1]} : vector<8x8xf32> to vector<8x1xf32>
    %64 = vector.broadcast %63 : vector<8x1xf32> to vector<8x32xf32>
    %65 = arith.mulf %64, %3 : vector<8x32xf32>
    %66 = arith.truncf %65 : vector<8x32xf32> to vector<8x32xbf16>
    %c0_28 = arith.constant 0 : index
    %c224 = arith.constant 224 : index
    %c0_29 = arith.constant 0 : index
    %67 = vector.load %arg3[%c0_28, %c224, %c0_29] : memref<1x256x32xbf16, #tpu.memory_space<vmem>>, vector<1x32x32xbf16>
    %68 = vector.shape_cast %67 : vector<1x32x32xbf16> to vector<32x32xbf16>
    %cst_30 = arith.constant dense<0.000000e+00> : vector<8x32xf32>
    %69 = tpu.matmul %66, %68, %cst_30 {dimension_numbers = #tpu.dot_dimension_numbers<[1], [0], [0], [1], [0, 0, 1, 1], [], []>} : vector<8x32xbf16>, vector<32x32xbf16>, vector<8x32xf32> -> vector<8x32xf32>
    %70 = arith.addf %62, %69 : vector<8x32xf32>
    %c0_31 = arith.constant 0 : index
    %c0_32 = arith.constant 0 : index
    %71 = vector.load %arg10[%c0_31, %c0_32] : memref<8x32xf32, #tpu.memory_space<vmem>>, vector<8x32xf32>
    tpu.vector_store %arg10[%c0_31, %c0_32], %70 {strides = array<i32>} : memref<8x32xf32, #tpu.memory_space<vmem>>, vector<8x32xf32>,
    %c3_i32 = arith.constant 3 : i32
    %72 = arith.cmpi eq, %arg0, %c3_i32 : i32
    %73 = arith.extui %72 : i1 to i32
    %c0_i32_33 = arith.constant 0 : i32
    %74 = arith.cmpi ne, %73, %c0_i32_33 : i32
    scf.if %74 {
      %c0_34 = arith.constant 0 : index
      %c0_35 = arith.constant 0 : index
      %75 = vector.load %arg10[%c0_34, %c0_35] : memref<8x32xf32, #tpu.memory_space<vmem>>, vector<8x32xf32>
      %cst_36 = arith.constant 0.000000e+00 : f32
      %76 = vector.broadcast %cst_36 : f32 to vector<8x32xf32>
      %77 = arith.maximumf %75, %76 : vector<8x32xf32>
      %c0_37 = arith.constant 0 : index
      %c0_38 = arith.constant 0 : index
      %78 = vector.load %arg5[%c0_37, %c0_38] : memref<32x32xf32, #tpu.memory_space<vmem>>, vector<32x32xf32>
      %cst_39 = arith.constant dense<0.000000e+00> : vector<8x32xf32>
      %79 = tpu.matmul %77, %78, %cst_39 {dimension_numbers = #tpu.dot_dimension_numbers<[1], [0], [0], [1], [0, 0, 1, 1], [], []>} : vector<8x32xf32>, vector<32x32xf32>, vector<8x32xf32> -> vector<8x32xf32>
      %c0_40 = arith.constant 0 : index
      %c0_41 = arith.constant 0 : index
      %80 = vector.load %arg6[%c0_40, %c0_41] : memref<1x32xf32, #tpu.memory_space<vmem>>, vector<1x32xf32>
      %81 = vector.broadcast %80 : vector<1x32xf32> to vector<8x32xf32>
      %82 = arith.addf %79, %81 : vector<8x32xf32>
      %cst_42 = arith.constant 0.000000e+00 : f32
      %83 = vector.broadcast %cst_42 : f32 to vector<8x32xf32>
      %84 = arith.maximumf %82, %83 : vector<8x32xf32>
      %c0_43 = arith.constant 0 : index
      %c0_44 = arith.constant 0 : index
      %85 = vector.load %arg7[%c0_43, %c0_44] : memref<32x128xf32, #tpu.memory_space<vmem>>, vector<32x128xf32>
      %cst_45 = arith.constant dense<0.000000e+00> : vector<8x128xf32>
      %86 = tpu.matmul %84, %85, %cst_45 {dimension_numbers = #tpu.dot_dimension_numbers<[1], [0], [0], [1], [0, 0, 1, 1], [], []>} : vector<8x32xf32>, vector<32x128xf32>, vector<8x128xf32> -> vector<8x128xf32>
      %c0_46 = arith.constant 0 : index
      %c0_47 = arith.constant 0 : index
      %87 = vector.load %arg8[%c0_46, %c0_47] : memref<1x128xf32, #tpu.memory_space<vmem>>, vector<1x128xf32>
      %88 = vector.broadcast %87 : vector<1x128xf32> to vector<8x128xf32>
      %89 = arith.addf %86, %88 : vector<8x128xf32>
      %c0_48 = arith.constant 0 : index
      %c0_49 = arith.constant 0 : index
      %90 = vector.load %arg9[%c0_48, %c0_49] : memref<8x128xf32, #tpu.memory_space<vmem>>, vector<8x128xf32>
      tpu.vector_store %arg9[%c0_48, %c0_49], %89 {strides = array<i32>} : memref<8x128xf32, #tpu.memory_space<vmem>>, vector<8x128xf32>,
    } else {
    }
    return
  }
  func.func @transform_0(%arg0: i32) -> (i32, i32, i32) {
    %c0_i32 = arith.constant 0 : i32
    %c0_i32_0 = arith.constant 0 : i32
    %c0_i32_1 = arith.constant 0 : i32
    return %arg0, %c0_i32, %c0_i32_0 : i32, i32, i32
  }
  func.func @transform_1(%arg0: i32) -> (i32, i32) {
    %c0_i32 = arith.constant 0 : i32
    %c0_i32_0 = arith.constant 0 : i32
    %c0_i32_1 = arith.constant 0 : i32
    return %c0_i32, %c0_i32_0 : i32, i32
  }
  func.func @transform_2(%arg0: i32) -> (i32, i32, i32) {
    %c0_i32 = arith.constant 0 : i32
    %c0_i32_0 = arith.constant 0 : i32
    %c0_i32_1 = arith.constant 0 : i32
    return %arg0, %c0_i32, %c0_i32_0 : i32, i32, i32
  }
  func.func @transform_3(%arg0: i32) -> (i32, i32) {
    %c0_i32 = arith.constant 0 : i32
    %c0_i32_0 = arith.constant 0 : i32
    %c0_i32_1 = arith.constant 0 : i32
    return %c0_i32, %c0_i32_0 : i32, i32
  }
  func.func @transform_4(%arg0: i32) -> (i32, i32) {
    %c0_i32 = arith.constant 0 : i32
    %c0_i32_0 = arith.constant 0 : i32
    %c0_i32_1 = arith.constant 0 : i32
    return %c0_i32, %c0_i32_0 : i32, i32
  }
  func.func @transform_5(%arg0: i32) -> (i32, i32) {
    %c0_i32 = arith.constant 0 : i32
    %c0_i32_0 = arith.constant 0 : i32
    %c0_i32_1 = arith.constant 0 : i32
    return %c0_i32, %c0_i32_0 : i32, i32
  }
  func.func @transform_6(%arg0: i32) -> (i32, i32) {
    %c0_i32 = arith.constant 0 : i32
    %c0_i32_0 = arith.constant 0 : i32
    %c0_i32_1 = arith.constant 0 : i32
    return %c0_i32, %c0_i32_0 : i32, i32
  }
  func.func @transform_7(%arg0: i32) -> (i32, i32) {
    %c0_i32 = arith.constant 0 : i32
    %c0_i32_0 = arith.constant 0 : i32
    %c0_i32_1 = arith.constant 0 : i32
    return %c0_i32, %c0_i32_0 : i32, i32
  }
  func.func @transform_8(%arg0: i32) -> (i32, i32) {
    %c0_i32 = arith.constant 0 : i32
    %c0_i32_0 = arith.constant 0 : i32
    %c0_i32_1 = arith.constant 0 : i32
    return %c0_i32, %c0_i32_0 : i32, i32
  }
}

</mosaic_0001>

<bundles_post_ra>
// kernel: clip_head_forward.1
= control target key start
LH: loop header
LB: loop body
LE: loop exit
PB: predicated region body
PF: predicated region fallthrough
CT: control target
= control target key end

     0   :  { %s1383_s27 = smov 0   ;;  %s1516_s0 = inlined_call_operand.vmem [shape: f32[4,8,8], index: 0, kind: input, shape index: {}]   ;;  %s1517_s1 = inlined_call_operand.vmem [shape: f32[8,32], index: 1, kind: input, shape index: {}]   ;;  %s1518_s2 = inlined_call_operand.vmem [shape: bf16[4,256,32], index: 2, kind: input, shape index: {}]   ;;  %s1519_s3 = inlined_call_operand.vmem [shape: f32[1,32], index: 3, kind: input, shape index: {}]   ;;  %s1520_s4 = inlined_call_operand.vmem [shape: f32[32,32], index: 4, kind: input, shape index: {}]   ;;  %s1521_s5 = inlined_call_operand.vmem [shape: f32[1,32], index: 5, kind: input, shape index: {}]   ;;  %s1522_s6 = inlined_call_operand.vmem [shape: f32[32,128], index: 6, kind: input, shape index: {}]   ;;  %s1523_s7 = inlined_call_operand.vmem [shape: f32[1,128], index: 7, kind: input, shape index: {}]   ;;  %s1524_s8 = inlined_call_operand.vmem [shape: f32[8,128], index: 8, kind: output, shape index: {}]  }
   0x1 LB: > { %s1389_s28 = sadd.s32 4294967295, %s1323_s27   ;;  %p1075_p0 = scmp.ge.s32.totalorder %s1323_s27, 1  ;;  %s1323_s27 = sphi %s1383_s27, %s18_s27  }
   0x2   : > { %p266_p1 = scmp.lt.s32.totalorder %s1323_s27, 5 }
   0x4   : > { %p267_p2 = pnand %p1075_p0, %p266_p1 }
   0x5   : > { %p299_p3 = scmp.lt.s32.totalorder (!%p267_p2), %s1389_s28, 3  ;;  %p1079_p4 = scmp.ne.s32.totalorder (!%p267_p2), %s1389_s28, 0 }
   0x6   : > { %270 = sbr.rel (%p267_p2) target bundleno = 851 (0x353), region = 52 }
   0xd   : > { %s300_s29 = scalar_select %p299_p3, %s1389_s28, 3 }
   0xe   : > { %312 = sbr.rel (%p1079_p4) target bundleno = 21 (0x15), region = 56  ;;  %v1080_v0 = vld [vmem:[%s1519_s3] ss:$0 sm:$0xff] (!%p1079_p4)  ;;  %vm320_vm0 = vcmask (!%p1079_p4), 261120  }
   0xf   : > { %s1076_s30 = sshll.u32 %s300_s29, 3  ;;  %s1112_s9 = sshll.u32 %s300_s29, 7  ;;  %321 = vst.msk [vmem:[#allocation2] sm:$0xff] (!%p1079_p4), %vm320_vm0, %v1080_v0 }
  0x10   : > { %s302_s12 = scalar_lea.vmem %s1516_s0, %s1076_s30  ;;  %s1401_s15 = scalar_lea.vmem %s1518_s2, %s1112_s9 }
  0x15 PF: > { %v323_v1 = vld [vmem:[%s302_s12] sm:$0xff]  ;;  %v1325_v3 = vmov 0   ;;  %v1326_v4 = vmov 1   ;;  %v1327_v5 = vmov 0.0   ;;  %v1302_v6 = vld [vmem:[%s1401_s15 + $0x8] sm:$0xff]   ;;  %vm1328_vm1 = vmmov 0  }
  0x16   : > { %v1301_v2 = vld [vmem:[%s1401_s15] sm:$0xff]   ;;  %1292 = vset.pattern.permute.xlu0 %v1325_v3  ;;  %1294 = vset.pattern.permute.xlu1 %v1326_v4  ;;  %v1329_v8 = vmov 4   ;;  %v1330_v9 = vmov 5   ;;  %v1304_v10 = vld [vmem:[%s1401_s15 + $0x48] sm:$0xff]   ;;  %v1331_v11 = vmov 2   ;;  %v1332_v12 = vmov 6  }
  0x17   : > { %327 = vperm.xlu0 %1292, %v323_v1   ;;  %394 = vperm.xlu1 %1294, %v323_v1   ;;  %v1303_v7 = vld [vmem:[%s1401_s15 + $0x40] sm:$0xff]   ;;  %v1333_v13 = vmov 3   ;;  %v1334_v14 = vmov 7   ;;  %vm348_vm2 = vcmask 261120   ;;  %v1305_v18 = vld [vmem:[%s1401_s15 + $0x10] sm:$0xff]   ;;  %v1307_v23 = vld [vmem:[%s1401_s15 + $0x18] sm:$0xff]  }
  0x18   : > { %1147 = vmatprep.subr.bf16.mxu1 %v1327_v5  ;;  %1179 = vmatprep.subr.bf16.mxu0 %v1327_v5  ;;  %v1424_v15 = vld [vmem:[%s1517_s1] sm:$0xff]  ;;  %v1306_v24 = vld [vmem:[%s1401_s15 + $0x50] sm:$0xff]   ;;  %v1308_v27 = vld [vmem:[%s1401_s15 + $0x58] sm:$0xff]   ;;  %p1105_p5 = scmp.ne.s32.totalorder %s1389_s28, 3 }
  0x19   : > { %1148 = vmatpush3.bf16.msra.mxu1 %v1301_v2  ;;  %1151 = vmatprep.mubr.msk.bf16.mxu1 %vm1328_vm1, %v1327_v5  ;;  %v1309_v31 = vld [vmem:[%s1401_s15 + $0x20] sm:$0xff]   ;;  %v1311_v34 = vld [vmem:[%s1401_s15 + $0x28] sm:$0xff]   ;;  %v1313_v41 = vld [vmem:[%s1401_s15 + $0x30] sm:$0xff]   ;;  %v1335_v2 = vmov (!%p1105_p5), 0.0|0.0   ;;  %vm1336_vm3 = vmmov (!%p1105_p5), 0  }
  0x1a   : > { %1149 = vmatprep.subr.bf16.mxu1 %v1327_v5  ;;  %1180 = vmatpush3.bf16.msra.mxu0 %v1303_v7  ;;  %v1310_v35 = vld [vmem:[%s1401_s15 + $0x60] sm:$0xff]   ;;  %v1312_v37 = vld [vmem:[%s1401_s15 + $0x68] sm:$0xff]   ;;  %v1315_v44 = vld [vmem:[%s1401_s15 + $0x38] sm:$0xff]  }
  0x1b   : > { %1293 = vset.pattern.permute.xlu0 %v1329_v8  ;;  %1295 = vset.pattern.permute.xlu1 %v1330_v9  ;;  %v1314_v45 = vld [vmem:[%s1401_s15 + $0x70] sm:$0xff]   ;;  %v1316_v47 = vld [vmem:[%s1401_s15 + $0x78] sm:$0xff]   ;;  %v324_v53 = vld [vmem:[#allocation2] sm:$0xff] }
  0x1c   : > { %592 = vperm.xlu0 %1293, %v323_v1   ;;  %658 = vperm.xlu1 %1295, %v323_v1   ;;  %v862_v63 = vld [vmem:[%s1520_s4] sm:$0xff] (!%p1105_p5)  ;;  %v863_v0 = vld [vmem:[%s1520_s4 + $0x8] sm:$0xff] (!%p1105_p5)  ;;  %v865_v4 = vld [vmem:[%s1520_s4 + $0x18] sm:$0xff] (!%p1105_p5) }
  0x1d   : > { %1150 = vmatpush3.bf16.msra.mxu1 %v1302_v6  ;;  %1181 = vmatprep.subr.bf16.mxu0 %v1327_v5  ;;  %v1234_v3 = vpack.c.bf16 (!%p1105_p5), %v863_v0, %v862_v63  ;;  %v947_v6 = vld [vmem:[%s1522_s6] sm:$0xff] (!%p1105_p5)  ;;  %v948_v7 = vld [vmem:[%s1522_s6 + $0x8] sm:$0xff] (!%p1105_p5) }
  0x1e   : > { %1155 = vmatprep.subr.bf16.mxu1 %v1327_v5  ;;  %1183 = vmatprep.mubr.msk.bf16.mxu0 %vm1328_vm1, %v1327_v5 }
  0x1f   : > { %1182 = vmatpush3.bf16.msra.mxu0 %v1304_v10  ;;  %v1240_v10 = vpack.c.bf16 (!%p1105_p5), %v948_v7, %v947_v6 }
  0x20   : > { %1296 = vset.pattern.permute.xlu1 %v1331_v11  ;;  %1297 = vset.pattern.permute.xlu0 %v1332_v12  ;;  %v949_v12 = vld [vmem:[%s1522_s6 + $0x10] sm:$0xff] (!%p1105_p5) }
  0x21   : > { %460 = vperm.xlu1 %1296, %v323_v1   ;;  %724 = vperm.xlu0 %1297, %v323_v1  }
  0x22   : > { %1187 = vmatprep.subr.bf16.mxu0 %v1327_v5 }
  0x25   : > { %1298 = vset.pattern.permute.xlu1 %v1333_v13  ;;  %1300 = vset.pattern.permute.xlu0 %v1334_v14  ;;  %v950_v13 = vld [vmem:[%s1522_s6 + $0x18] sm:$0xff] (!%p1105_p5) }
  0x26   : > { %526 = vperm.xlu1 %1298, %v323_v1  }
  0x2a   : > { %1299 = vset.pattern.permute.xlu1 %v1334_v14  ;;  %v1243_v14 = vpack.c.bf16 (!%p1105_p5), %v950_v13, %v949_v12 }
  0x2b   : > { %790 = vperm.xlu1 %1299, %v323_v1   ;;  %v864_v1 = vld [vmem:[%s1520_s4 + $0x10] sm:$0xff] (!%p1105_p5) }
  0x2c   : > { %v1237_v8 = vpack.c.bf16 (!%p1105_p5), %v865_v4, %v864_v1 }
  0x96   : > { %v328_v16 = vpop.permute.xlu0 %327  ;;  %v395_v21 = vpop.permute.xlu1 %394 }
  0x97   : > { %v330_v17 = vmul.f32 %v328_v16, %v1424_v15  ;;  %v397_v26 = vmul.f32 %v395_v21, %v1424_v15 }
  0x99   : > { %v331_v19 = vpack.c.bf16 %v330_v17, %v330_v17  ;;  %v398_v29 = vpack.c.bf16 %v397_v26, %v397_v26 }
  0x9b   : > { %v593_v20 = vpop.permute.xlu0 %592  ;;  %1152 = vmatmul.mubr.msk.bf16.vlgmr.msra.gmra.mrb[0].mxu1 %vm348_vm2, %v331_v19  ;;  %v659_v28 = vpop.permute.xlu1 %658 }
  0x9c   : > { %v595_v22 = vmul.f32 %v593_v20, %v1424_v15  ;;  %1156 = vmatpush3.bf16.msra.mxu1 %v1305_v18  ;;  %1159 = vmatprep.mubr.msk.bf16.mxu1 %vm1328_vm1, %v1327_v5  ;;  %v661_v30 = vmul.f32 %v659_v28, %v1424_v15  ;;  %v1108_v20 = vld [vmem:[%s1523_s7] ss:$0 sm:$0xff] (!%p1105_p5) }
  0x9d   : > { %1157 = vmatprep.subr.bf16.mxu1 %v1327_v5 }
  0x9e   : > { %v596_v25 = vpack.c.bf16 %v595_v22, %v595_v22  ;;  %v662_v32 = vpack.c.bf16 %v661_v30, %v661_v30 }
  0xa0   : > { %1184 = vmatmul.mubr.msk.bf16.vlgmr.msra.gmra.mrb[0].mxu0 %vm348_vm2, %v596_v25  ;;  %1158 = vmatpush3.bf16.msra.mxu1 %v1307_v23  ;;  %v461_v33 = vpop.permute.xlu1 %460  ;;  %v725_v38 = vpop.permute.xlu0 %724 }
  0xa1   : > { %1188 = vmatpush3.bf16.msra.mxu0 %v1306_v24  ;;  %1163 = vmatprep.subr.bf16.mxu1 %v1327_v5  ;;  %v463_v36 = vmul.f32 %v461_v33, %v1424_v15  ;;  %v727_v40 = vmul.f32 %v725_v38, %v1424_v15 }
  0xa2   : > { %1189 = vmatprep.subr.bf16.mxu0 %v1327_v5  ;;  %1191 = vmatprep.mubr.msk.bf16.mxu0 %vm1328_vm1, %v1327_v5 }
  0xa3   : > { %v464_v39 = vpack.c.bf16 %v463_v36, %v463_v36  ;;  %v728_v43 = vpack.c.bf16 %v727_v40, %v727_v40 }
  0xa5   : > { %1190 = vmatpush3.bf16.msra.mxu0 %v1308_v27  ;;  %v527_v42 = vpop.permute.xlu1 %526 }
  0xa6   : > { %1195 = vmatprep.subr.bf16.mxu0 %v1327_v5  ;;  %v529_v46 = vmul.f32 %v527_v42, %v1424_v15 }
  0xa7   : > { %1160 = vmatmul.mubr.msk.bf16.vlgmr.msra.gmra.mrb[0].mxu1 %vm348_vm2, %v398_v29 }
  0xa8   : > { %1164 = vmatpush3.bf16.msra.mxu1 %v1309_v31  ;;  %1167 = vmatprep.mubr.msk.bf16.mxu1 %vm1328_vm1, %v1327_v5  ;;  %v530_v49 = vpack.c.bf16 %v529_v46, %v529_v46 }
  0xa9   : > { %1165 = vmatprep.subr.bf16.mxu1 %v1327_v5 }
  0xaa   : > { %v791_v48 = vpop.permute.xlu1 %790 }
  0xab   : > { %v793_v50 = vmul.f32 %v791_v48, %v1424_v15  ;;  %v1106_v15 = vld [vmem:[%s1521_s5] ss:$0 sm:$0xff] (!%p1105_p5) }
  0xac   : > { %1192 = vmatmul.mubr.msk.bf16.vlgmr.msra.gmra.mrb[0].mxu0 %vm348_vm2, %v662_v32  ;;  %1166 = vmatpush3.bf16.msra.mxu1 %v1311_v34 }
  0xad   : > { %1196 = vmatpush3.bf16.msra.mxu0 %v1310_v35  ;;  %1171 = vmatprep.subr.bf16.mxu1 %v1327_v5  ;;  %v794_v51 = vpack.c.bf16 %v793_v50, %v793_v50 }
  0xae   : > { %1197 = vmatprep.subr.bf16.mxu0 %v1327_v5  ;;  %1199 = vmatprep.mubr.msk.bf16.mxu0 %vm1328_vm1, %v1327_v5 }
  0xb1   : > { %1198 = vmatpush3.bf16.msra.mxu0 %v1312_v37 }
  0xb2   : > { %1203 = vmatprep.subr.bf16.mxu0 %v1327_v5 }
  0xb3   : > { %1168 = vmatmul.mubr.msk.bf16.vlgmr.msra.gmra.mrb[0].mxu1 %vm348_vm2, %v464_v39 }
  0xb4   : > { %1172 = vmatpush3.bf16.msra.mxu1 %v1313_v41  ;;  %1175 = vmatprep.mubr.msk.bf16.mxu1 %vm1328_vm1, %v1327_v5 }
  0xb5   : > { %1173 = vmatprep.subr.bf16.mxu1 %v1327_v5 }
  0xb8   : > { %1200 = vmatmul.mubr.msk.bf16.vlgmr.msra.gmra.mrb[0].mxu0 %vm348_vm2, %v728_v43  ;;  %1174 = vmatpush3.bf16.msra.mxu1 %v1315_v44 }
  0xb9   : > { %1204 = vmatpush3.bf16.msra.mxu0 %v1314_v45  ;;  %1207 = vmatprep.mubr.msk.bf16.mxu0 %vm1328_vm1, %v1327_v5 }
  0xba   : > { %1205 = vmatprep.subr.bf16.mxu0 %v1327_v5  ;;  %v1337_v5 = vmov (!%p1105_p5), 0.0   ;;  %1239 = vmatprep.subr.bf16.mxu1 (!%p1105_p5), %v1335_v2 }
  0xbd   : > { %1206 = vmatpush3.bf16.msra.mxu0 %v1316_v47 }
  0xbe   : > { %1233 = vmatprep.subr.bf16.mxu0 (!%p1105_p5), %v1335_v2 }
  0xbf   : > { %1176 = vmatmul.mubr.msk.bf16.vlgmr.msra.gmra.mrb[0].mxu1 %vm348_vm2, %v530_v49 }
  0xc0   : > { %1230 = vmatprep.mubr.msk.f32.mxu1 (!%p1105_p5), %vm1336_vm3, %v1337_v5  ;;  %1241 = vmatpush3.bf16.msra.mxu1 (!%p1105_p5), %v1240_v10 }
  0xc1   : > { %1242 = vmatprep.subr.bf16.mxu1 (!%p1105_p5), %v1335_v2 }
  0xc4   : > { %1208 = vmatmul.mubr.msk.bf16.vlgmr.msra.gmra.mrb[0].mxu0 %vm348_vm2, %v794_v51  ;;  %1244 = vmatpush3.bf16.msra.mxu1 (!%p1105_p5), %v1243_v14 }
  0xc5   : > { %1219 = vmatprep.mubr.msk.f32.mxu0 (!%p1105_p5), %vm1336_vm3, %v1337_v5  ;;  %1235 = vmatpush3.bf16.msra.mxu0 (!%p1105_p5), %v1234_v3 }
  0xc6   : > { %1236 = vmatprep.subr.bf16.mxu0 (!%p1105_p5), %v1335_v2 }
  0xc9   : > { %1238 = vmatpush3.bf16.msra.mxu0 (!%p1105_p5), %v1237_v8 }
 0x192   : > { %v584_v52 = vpop.f32.mrb[0].mxu1 }
 0x193   : > { %v1177_v54 = vpop.f32.mrb[1].mxu1  ;;  %v1245_v57 = vadd.f32 %v584_v52, %v324_v53 }
 0x194   : > { %v587_v55 = vpop.f32.mrb[2].mxu1  ;;  %859 = sbr.rel (%p1105_p5) target bundleno = 851 (0x353), region = 60 }
 0x195   : > { %v1178_v56 = vpop.f32.mrb[3].mxu1 }
 0x197   : > { %v848_v58 = vpop.f32.mrb[0].mxu0 }
 0x198   : > { %v1246_v59 = vadd.f32 %v1245_v57, %v848_v58  ;;  %v1209_v60 = vpop.f32.mrb[1].mxu0 }
 0x199   : > { %v851_v61 = vpop.f32.mrb[2].mxu0 }
 0x19a   : > { %855 = vst.msk [vmem:[#allocation2] sm:$0xff] %vm348_vm2, %v1246_v59  ;;  %v1210_v62 = vpop.f32.mrb[3].mxu0 }
 0x1a1   : > { %v860_v9 = vld [vmem:[#allocation2] sm:$0xff] }
 0x1a2   : > { %v861_v11 = vmax.f32 %v860_v9, 0.0 }
 0x1a4   : > { %1220 = vmatmul.mubr.msk.f32.vlgmr.msra.gmra.mrb[0].mxu0 %vm348_vm2, %v861_v11 }
 0x277   : > { %v942_v16 = vpop.f32.mrb[0].mxu0 }
 0x278   : > { %v943_v17 = vadd.f32 %v1106_v15, %v942_v16  ;;  %v1221_v18 = vpop.f32.mrb[1].mxu0 }
 0x27a   : > { %v946_v19 = vmax.f32 %v943_v17, 0.0 }
 0x27c   : > { %1231 = vmatmul.mubr.msk.f32.vlgmr.msra.gmra.mrb[0].mxu1 %vm348_vm2, %v946_v19 }
 0x34f   : > { %v1027_v21 = vpop.f32.mrb[0].mxu1 }
 0x350   : > { %v1028_v22 = vadd.f32 %v1108_v20, %v1027_v21  ;;  %v1232_v23 = vpop.f32.mrb[1].mxu1 }
 0x352   : > { %1031 = vst [vmem:[%s1524_s8] sm:$0xff] %v1028_v22 }
 0x353 PF: > { %s18_s27 = sadd.s32 1, %s1323_s27  }
 0x354   : > { %p15_p6 = scmp.ge.s32.totalorder %s18_s27, 6  }
 0x356   :  { %17 = sbr.rel (!%p15_p6) target bundleno = 1 (0x1), region = 89 }

</bundles_post_ra>
